<compile_context>
chip_gen: v6e
topology: v6e:2x2x1
jax: 0.10.0
libtpu: 0.0.40
codegen_flags: <defaults>
</compile_context>

<pallas_src>
import functools

import jax
import jax.numpy as jnp
from jax import lax
from jax.experimental import pallas as pl
from jax.experimental.pallas import tpu as pltpu

COMPUTE_DTYPE = jnp.bfloat16  # MXU operand dtype; accumulation stays f32.


# -----------------------------------------------------------------------------
# Fused Pallas kernel: [3x3 conv (deep-K matmul) + folded-BN bias + ReLU] x 2
# -----------------------------------------------------------------------------
def _pad_flat(x_flat, cin, dtype):
    """(H, W*cin) -> zero-padded (H+2, (W+2)*cin), cast to `dtype`.

    In the row-major (w, ci) flattened layout, padding=1 along W is just `cin`
    zero lanes on each side of the lane axis; padding along H is one zero row
    top/bottom.  Both are cheap concats (no reshapes, no masked stores).
    """
    h = x_flat.shape[0]
    x = x_flat.astype(dtype)
    zc = jnp.zeros((h, cin), dtype)
    interior = jnp.concatenate([zc, x, zc], axis=-1)          # (H, (W+2)*cin)
    zr = jnp.zeros((1, interior.shape[-1]), dtype)
    return jnp.concatenate([zr, interior, zr], axis=0)        # (H+2, (W+2)*cin)


def _conv3x3_flat(xp_flat, w_all, b_flat, cin, h, w):
    """3x3 conv on the lane-flattened layout as one deep-K MXU matmul.

    xp_flat: (H+2, (W+2)*cin)  zero-padded input, bf16
    w_all:   (9*W*cin, W*cout) block-diagonal tap weights kron(I_W, w_tap),
                               taps stacked in (dh, dw) row-major order, bf16
    b_flat:  (1, W*cout)       per-pixel-tiled folded conv/BN bias, f32
    returns: (H, W*cout) f32   conv + bias (no activation)
    """
    slabs = []
    for dh in range(3):
        for dw in range(3):
            slabs.append(xp_flat[dh:dh + h, dw * cin:dw * cin + w * cin])
    patches = jnp.concatenate(slabs, axis=-1)                 # (H, 9*W*cin) bf16
    y = jnp.dot(patches, w_all, preferred_element_type=jnp.float32)
    return y + b_flat                                         # (H, W*cout) f32


def _double_conv_kernel(x_ref, w1_ref, b1_ref, w2_ref, b2_ref, o_ref, *,
                        h, w, cin, c1):
    """One full image per grid step.

    x_ref:  (1, H, W*cin)   bf16 input image (unpadded, lane-flattened)
    w1_ref: (9*W*cin, W*c1) bf16;  b1_ref: (1, W*c1) f32
    w2_ref: (9*W*c1, W*c2)  bf16;  b2_ref: (1, W*c2) f32
    o_ref:  (1, H, W*c2)    f32 output image (lane-dense, W*c2 = 128 lanes)
    """
    xp1 = _pad_flat(x_ref[0], cin, COMPUTE_DTYPE)
    y1 = _conv3x3_flat(xp1, w1_ref[...], b1_ref[...], cin, h, w)
    y1 = jnp.maximum(y1, 0.0)                                 # ReLU, f32

    xp2 = _pad_flat(y1, c1, COMPUTE_DTYPE)                    # bf16 intermediate
    y2 = _conv3x3_flat(xp2, w2_ref[...], b2_ref[...], c1, h, w)
    y2 = jnp.maximum(y2, 0.0)

    o_ref[0] = y2.astype(o_ref.dtype)


# -----------------------------------------------------------------------------
# inconv forward (NCHW in / NCHW out, matching the PyTorch module)
# -----------------------------------------------------------------------------
def inconv_forward(x_nchw, flat_params):
    """x_nchw: (N, Cin, H, W) f32 -> (N, Cout, H, W) f32."""
    w1_all, b1_flat, w2_all, b2_flat = flat_params
    n, cin, h, w = x_nchw.shape
    c1 = b1_flat.shape[-1] // w
    c2 = b2_flat.shape[-1] // w

    # NCHW -> (N, H, W*Cin) lane-flattened bf16 (the only wrapper layout op).
    x_flat = jnp.transpose(x_nchw, (0, 2, 3, 1)).reshape(n, h, w * cin)
    x_flat = x_flat.astype(COMPUTE_DTYPE)

    kernel = functools.partial(_double_conv_kernel, h=h, w=w, cin=cin, c1=c1)
    y_flat = pl.pallas_call(
        kernel,
        out_shape=jax.ShapeDtypeStruct((n, h, w * c2), jnp.float32),
        grid=(n,),
        in_specs=[
            pl.BlockSpec((1, h, w * cin), lambda b: (b, 0, 0)),
            pl.BlockSpec(w1_all.shape, lambda b: (0, 0)),
            pl.BlockSpec(b1_flat.shape, lambda b: (0, 0)),
            pl.BlockSpec(w2_all.shape, lambda b: (0, 0)),
            pl.BlockSpec(b2_flat.shape, lambda b: (0, 0)),
        ],
        out_specs=pl.BlockSpec((1, h, w * c2), lambda b: (b, 0, 0)),
        compiler_params=pltpu.CompilerParams(
            dimension_semantics=("parallel",)),
    )(x_flat, w1_all, b1_flat, w2_all, b2_flat)

    return jnp.transpose(y_flat.reshape(n, h, w, c2), (0, 3, 1, 2))


# -----------------------------------------------------------------------------
# Parameter init (synthetic conv + BN, folded to weight/bias) + flat repack
# -----------------------------------------------------------------------------
def _init_conv_bn(key, cin, cout):
    k1, k2, k3, k4, k5, k6 = jax.random.split(key, 6)
    wt = 0.1 * jax.random.normal(k1, (3, 3, cin, cout), jnp.float32)  # HWIO
    b = 0.1 * jax.random.normal(k2, (cout,), jnp.float32)
    gamma = 1.0 + 0.1 * jax.random.normal(k3, (cout,), jnp.float32)
    beta = 0.1 * jax.random.normal(k4, (cout,), jnp.float32)
    mean = 0.1 * jax.random.normal(k5, (cout,), jnp.float32)
    var = 1.0 + 0.1 * jax.random.normal(k6, (cout,), jnp.float32) ** 2
    scale = gamma / jnp.sqrt(var + 1e-5)
    w_hwio = (wt * scale[None, None, None, :]).astype(COMPUTE_DTYPE)  # fold BN scale
    bias = ((b - mean) * scale + beta).astype(jnp.float32)            # folded bias
    return w_hwio, bias


def _flatten_conv_params(w_hwio, bias, w):
    """Build block-diagonal kron(I_W, w_tap) weights and the per-pixel bias."""
    eye = jnp.eye(w, dtype=jnp.float32)
    blocks = [jnp.kron(eye, w_hwio[dh, dw].astype(jnp.float32))
              for dh in range(3) for dw in range(3)]                  # (W*cin, W*cout)
    w_all = jnp.concatenate(blocks, axis=0).astype(COMPUTE_DTYPE)     # (9*W*cin, W*cout)
    b_flat = jnp.tile(bias, w)[None, :].astype(jnp.float32)           # (1, W*cout)
    return w_all, b_flat


def init_inconv_params(key, in_ch, out_ch, w):
    k1, k2 = jax.random.split(key)
    w1_hwio, b1 = _init_conv_bn(k1, in_ch, out_ch)
    w2_hwio, b2 = _init_conv_bn(k2, out_ch, out_ch)
    w1_all, b1_flat = _flatten_conv_params(w1_hwio, b1, w)
    w2_all, b2_flat = _flatten_conv_params(w2_hwio, b2, w)
    return {
        "flat": (w1_all, b1_flat, w2_all, b2_flat),   # kernel parameters
        "hwio": ((w1_hwio, b1), (w2_hwio, b2)),       # reference parameters
    }


# -----------------------------------------------------------------------------
# Pure-JAX reference (same bf16 rounding points) for correctness check
# -----------------------------------------------------------------------------
def _ref_conv(x_f32, w_hwio, bias, relu):
    y = lax.conv_general_dilated(
        x_f32, w_hwio.astype(jnp.float32),
        window_strides=(1, 1), padding=((1, 1), (1, 1)),
        dimension_numbers=("NHWC", "HWIO", "NHWC"),
        precision=lax.Precision.HIGHEST)
    y = y + bias
    return jnp.maximum(y, 0.0) if relu else y


def reference_forward(x_nchw, hwio_params):
    (w1, b1), (w2, b2) = hwio_params
    x = jnp.transpose(x_nchw, (0, 2, 3, 1))
    x = x.astype(COMPUTE_DTYPE).astype(jnp.float32)
    h1 = _ref_conv(x, w1, b1, True).astype(COMPUTE_DTYPE).astype(jnp.float32)
    h2 = _ref_conv(h1, w2, b2, True)
    return jnp.transpose(h2, (0, 3, 1, 2))


# -----------------------------------------------------------------------------
if __name__ == "__main__":
    N, C_IN, C_OUT, H, W = 2, 4, 8, 16, 16

    key = jax.random.PRNGKey(0)
    k_param, k_x = jax.random.split(key)
    params = init_inconv_params(k_param, C_IN, C_OUT, W)
    x = jax.random.normal(k_x, (N, C_IN, H, W), jnp.float32)

    out = jax.jit(inconv_forward)(x, params["flat"])
    jax.block_until_ready(out)

    assert out.shape == (N, C_OUT, H, W), out.shape
    assert jnp.all(jnp.isfinite(out))

    ref = reference_forward(x, params["hwio"])
    max_err = float(jnp.max(jnp.abs(out - ref)))
    assert max_err < 5e-2, f"max abs error vs reference: {max_err}"

    print("KERNEL_OK")
</pallas_src>

<mosaic_0001>
module attributes {stable_mosaic.version = 11 : i64} {
  func.func @_double_conv_kernel(%arg0: i32, %arg1: memref<1x16x64xbf16, #tpu.memory_space<vmem>>, %arg2: memref<576x128xbf16, #tpu.memory_space<vmem>>, %arg3: memref<1x128xf32, #tpu.memory_space<vmem>>, %arg4: memref<1152x128xbf16, #tpu.memory_space<vmem>>, %arg5: memref<1x128xf32, #tpu.memory_space<vmem>>, %arg6: memref<1x16x128xf32, #tpu.memory_space<vmem>>) attributes {dimension_semantics = [#tpu.dimension_semantics<parallel>], iteration_bounds = array<i64: 2>, scalar_prefetch = 0 : i64, scratch_operands = 0 : i64, tpu.core_type = #tpu.core_type<tc>, window_params = [{transform_indices = @transform_0, window_bounds = array<i64: 1, 16, 64>}, {pipeline_mode = #tpu.pipeline_mode<synchronous>, transform_indices = @transform_1, window_bounds = array<i64: 576, 128>}, {pipeline_mode = #tpu.pipeline_mode<synchronous>, transform_indices = @transform_2, window_bounds = array<i64: 1, 128>}, {pipeline_mode = #tpu.pipeline_mode<synchronous>, transform_indices = @transform_3, window_bounds = array<i64: 1152, 128>}, {pipeline_mode = #tpu.pipeline_mode<synchronous>, transform_indices = @transform_4, window_bounds = array<i64: 1, 128>}, {transform_indices = @transform_5, window_bounds = array<i64: 1, 16, 128>}]} {
    %c0 = arith.constant 0 : index
    %c0_0 = arith.constant 0 : index
    %c0_1 = arith.constant 0 : index
    %0 = vector.load %arg1[%c0, %c0_0, %c0_1] : memref<1x16x64xbf16, #tpu.memory_space<vmem>>, vector<1x16x64xbf16>
    %1 = vector.shape_cast %0 : vector<1x16x64xbf16> to vector<16x64xbf16>
    %cst = arith.constant 0.000000e+00 : bf16
    %2 = vector.broadcast %cst : bf16 to vector<16x4xbf16>
    %3 = tpu.concatenate %2, %1, %2 in 1 : vector<16x4xbf16>, vector<16x64xbf16>, vector<16x4xbf16> -> vector<16x72xbf16>
    %cst_2 = arith.constant 0.000000e+00 : bf16
    %4 = vector.broadcast %cst_2 : bf16 to vector<1x72xbf16>
    %5 = tpu.concatenate %4, %3, %4 in 0 : vector<1x72xbf16>, vector<16x72xbf16>, vector<1x72xbf16> -> vector<18x72xbf16>
    %c0_3 = arith.constant 0 : index
    %c0_4 = arith.constant 0 : index
    %6 = vector.load %arg2[%c0_3, %c0_4] : memref<576x128xbf16, #tpu.memory_space<vmem>>, vector<576x128xbf16>
    %c0_5 = arith.constant 0 : index
    %c0_6 = arith.constant 0 : index
    %7 = vector.load %arg3[%c0_5, %c0_6] : memref<1x128xf32, #tpu.memory_space<vmem>>, vector<1x128xf32>
    %8 = vector.extract_strided_slice %5 {offsets = [0, 0], sizes = [16, 64], strides = [1, 1]} : vector<18x72xbf16> to vector<16x64xbf16>
    %9 = vector.extract_strided_slice %5 {offsets = [0, 4], sizes = [16, 64], strides = [1, 1]} : vector<18x72xbf16> to vector<16x64xbf16>
    %10 = vector.extract_strided_slice %5 {offsets = [0, 8], sizes = [16, 64], strides = [1, 1]} : vector<18x72xbf16> to vector<16x64xbf16>
    %11 = vector.extract_strided_slice %5 {offsets = [1, 0], sizes = [16, 64], strides = [1, 1]} : vector<18x72xbf16> to vector<16x64xbf16>
    %12 = vector.extract_strided_slice %5 {offsets = [1, 4], sizes = [16, 64], strides = [1, 1]} : vector<18x72xbf16> to vector<16x64xbf16>
    %13 = vector.extract_strided_slice %5 {offsets = [1, 8], sizes = [16, 64], strides = [1, 1]} : vector<18x72xbf16> to vector<16x64xbf16>
    %14 = vector.extract_strided_slice %5 {offsets = [2, 0], sizes = [16, 64], strides = [1, 1]} : vector<18x72xbf16> to vector<16x64xbf16>
    %15 = vector.extract_strided_slice %5 {offsets = [2, 4], sizes = [16, 64], strides = [1, 1]} : vector<18x72xbf16> to vector<16x64xbf16>
    %16 = vector.extract_strided_slice %5 {offsets = [2, 8], sizes = [16, 64], strides = [1, 1]} : vector<18x72xbf16> to vector<16x64xbf16>
    %17 = tpu.concatenate %8, %9, %10, %11, %12, %13, %14, %15, %16 in 1 : vector<16x64xbf16>, vector<16x64xbf16>, vector<16x64xbf16>, vector<16x64xbf16>, vector<16x64xbf16>, vector<16x64xbf16>, vector<16x64xbf16>, vector<16x64xbf16>, vector<16x64xbf16> -> vector<16x576xbf16>
    %cst_7 = arith.constant dense<0.000000e+00> : vector<16x128xf32>
    %18 = tpu.matmul %17, %6, %cst_7 {dimension_numbers = #tpu.dot_dimension_numbers<[1], [0], [0], [1], [0, 0, 1, 1], [], []>} : vector<16x576xbf16>, vector<576x128xbf16>, vector<16x128xf32> -> vector<16x128xf32>
    %19 = vector.broadcast %7 : vector<1x128xf32> to vector<16x128xf32>
    %20 = arith.addf %18, %19 : vector<16x128xf32>
    %cst_8 = arith.constant 0.000000e+00 : f32
    %21 = vector.broadcast %cst_8 : f32 to vector<16x128xf32>
    %22 = arith.maximumf %20, %21 : vector<16x128xf32>
    %23 = arith.truncf %22 : vector<16x128xf32> to vector<16x128xbf16>
    %cst_9 = arith.constant 0.000000e+00 : bf16
    %24 = vector.broadcast %cst_9 : bf16 to vector<16x8xbf16>
    %25 = tpu.concatenate %24, %23, %24 in 1 : vector<16x8xbf16>, vector<16x128xbf16>, vector<16x8xbf16> -> vector<16x144xbf16>
    %cst_10 = arith.constant 0.000000e+00 : bf16
    %26 = vector.broadcast %cst_10 : bf16 to vector<1x144xbf16>
    %27 = tpu.concatenate %26, %25, %26 in 0 : vector<1x144xbf16>, vector<16x144xbf16>, vector<1x144xbf16> -> vector<18x144xbf16>
    %c0_11 = arith.constant 0 : index
    %c0_12 = arith.constant 0 : index
    %28 = vector.load %arg4[%c0_11, %c0_12] : memref<1152x128xbf16, #tpu.memory_space<vmem>>, vector<1152x128xbf16>
    %c0_13 = arith.constant 0 : index
    %c0_14 = arith.constant 0 : index
    %29 = vector.load %arg5[%c0_13, %c0_14] : memref<1x128xf32, #tpu.memory_space<vmem>>, vector<1x128xf32>
    %30 = vector.extract_strided_slice %27 {offsets = [0, 0], sizes = [16, 128], strides = [1, 1]} : vector<18x144xbf16> to vector<16x128xbf16>
    %31 = vector.extract_strided_slice %27 {offsets = [0, 8], sizes = [16, 128], strides = [1, 1]} : vector<18x144xbf16> to vector<16x128xbf16>
    %32 = vector.extract_strided_slice %27 {offsets = [0, 16], sizes = [16, 128], strides = [1, 1]} : vector<18x144xbf16> to vector<16x128xbf16>
    %33 = vector.extract_strided_slice %27 {offsets = [1, 0], sizes = [16, 128], strides = [1, 1]} : vector<18x144xbf16> to vector<16x128xbf16>
    %34 = vector.extract_strided_slice %27 {offsets = [1, 8], sizes = [16, 128], strides = [1, 1]} : vector<18x144xbf16> to vector<16x128xbf16>
    %35 = vector.extract_strided_slice %27 {offsets = [1, 16], sizes = [16, 128], strides = [1, 1]} : vector<18x144xbf16> to vector<16x128xbf16>
    %36 = vector.extract_strided_slice %27 {offsets = [2, 0], sizes = [16, 128], strides = [1, 1]} : vector<18x144xbf16> to vector<16x128xbf16>
    %37 = vector.extract_strided_slice %27 {offsets = [2, 8], sizes = [16, 128], strides = [1, 1]} : vector<18x144xbf16> to vector<16x128xbf16>
    %38 = vector.extract_strided_slice %27 {offsets = [2, 16], sizes = [16, 128], strides = [1, 1]} : vector<18x144xbf16> to vector<16x128xbf16>
    %39 = tpu.concatenate %30, %31, %32, %33, %34, %35, %36, %37, %38 in 1 : vector<16x128xbf16>, vector<16x128xbf16>, vector<16x128xbf16>, vector<16x128xbf16>, vector<16x128xbf16>, vector<16x128xbf16>, vector<16x128xbf16>, vector<16x128xbf16>, vector<16x128xbf16> -> vector<16x1152xbf16>
    %cst_15 = arith.constant dense<0.000000e+00> : vector<16x128xf32>
    %40 = tpu.matmul %39, %28, %cst_15 {dimension_numbers = #tpu.dot_dimension_numbers<[1], [0], [0], [1], [0, 0, 1, 1], [], []>} : vector<16x1152xbf16>, vector<1152x128xbf16>, vector<16x128xf32> -> vector<16x128xf32>
    %41 = vector.broadcast %29 : vector<1x128xf32> to vector<16x128xf32>
    %42 = arith.addf %40, %41 : vector<16x128xf32>
    %cst_16 = arith.constant 0.000000e+00 : f32
    %43 = vector.broadcast %cst_16 : f32 to vector<16x128xf32>
    %44 = arith.maximumf %42, %43 : vector<16x128xf32>
    %c0_17 = arith.constant 0 : index
    %c0_18 = arith.constant 0 : index
    %c0_19 = arith.constant 0 : index
    %45 = vector.load %arg6[%c0_17, %c0_18, %c0_19] : memref<1x16x128xf32, #tpu.memory_space<vmem>>, vector<1x16x128xf32>
    %46 = vector.shape_cast %45 : vector<1x16x128xf32> to vector<16x128xf32>
    %47 = vector.shape_cast %44 : vector<16x128xf32> to vector<1x16x128xf32>
    tpu.vector_store %arg6[%c0_17, %c0_18, %c0_19], %47 {strides = array<i32>} : memref<1x16x128xf32, #tpu.memory_space<vmem>>, vector<1x16x128xf32>,
    return
  }
  func.func @transform_0(%arg0: i32) -> (i32, i32, i32) {
    %c0_i32 = arith.constant 0 : i32
    %c0_i32_0 = arith.constant 0 : i32
    %c0_i32_1 = arith.constant 0 : i32
    return %arg0, %c0_i32, %c0_i32_0 : i32, i32, i32
  }
  func.func @transform_1(%arg0: i32) -> (i32, i32) {
    %c0_i32 = arith.constant 0 : i32
    %c0_i32_0 = arith.constant 0 : i32
    %c0_i32_1 = arith.constant 0 : i32
    return %c0_i32, %c0_i32_0 : i32, i32
  }
  func.func @transform_2(%arg0: i32) -> (i32, i32) {
    %c0_i32 = arith.constant 0 : i32
    %c0_i32_0 = arith.constant 0 : i32
    %c0_i32_1 = arith.constant 0 : i32
    return %c0_i32, %c0_i32_0 : i32, i32
  }
  func.func @transform_3(%arg0: i32) -> (i32, i32) {
    %c0_i32 = arith.constant 0 : i32
    %c0_i32_0 = arith.constant 0 : i32
    %c0_i32_1 = arith.constant 0 : i32
    return %c0_i32, %c0_i32_0 : i32, i32
  }
  func.func @transform_4(%arg0: i32) -> (i32, i32) {
    %c0_i32 = arith.constant 0 : i32
    %c0_i32_0 = arith.constant 0 : i32
    %c0_i32_1 = arith.constant 0 : i32
    return %c0_i32, %c0_i32_0 : i32, i32
  }
  func.func @transform_5(%arg0: i32) -> (i32, i32, i32) {
    %c0_i32 = arith.constant 0 : i32
    %c0_i32_0 = arith.constant 0 : i32
    %c0_i32_1 = arith.constant 0 : i32
    return %arg0, %c0_i32, %c0_i32_0 : i32, i32, i32
  }
}

</mosaic_0001>

<bundles_post_ra>
// kernel: inconv_forward.1
= control target key start
LH: loop header
LB: loop body
LE: loop exit
PB: predicated region body
PF: predicated region fallthrough
CT: control target
= control target key end

     0   :  { %10 = vsyncpa [#allocation3], 0  ;;  %s2228_s18 = smov 0   ;;  %s2439_s0 = inlined_call_operand.vmem [shape: bf16[2,16,64], index: 0, kind: input, shape index: {}]   ;;  %s2440_s1 = inlined_call_operand.vmem [shape: bf16[576,128], index: 1, kind: input, shape index: {}]   ;;  %s2441_s2 = inlined_call_operand.vmem [shape: f32[1,128], index: 2, kind: input, shape index: {}]   ;;  %s2442_s3 = inlined_call_operand.hbm [shape: bf16[1152,128], index: 3, kind: input, shape index: {}]   ;;  %s2443_s4 = inlined_call_operand.vmem [shape: f32[1,128], index: 4, kind: input, shape index: {}]   ;;  %s2444_s5 = inlined_call_operand.vmem [shape: f32[2,16,128], index: 5, kind: output, shape index: {}]  }
   0x1 LB: > { %s1702_s19 = sadd.s32 4294967295, %s2183_s18   ;;  %p1704_p0 = scmp.ge.s32.totalorder %s2183_s18, 1  ;;  %s2183_s18 = sphi %s2228_s18, %s16_s18  }
   0x2   : > { %p157_p1 = scmp.lt.s32.totalorder %s2183_s18, 3  ;;  %s2185_s20 = smov [#allocation2]  }
   0x3   : > { %s175_s21 = sshll.u32 %s2185_s20, 4  ;;  %p2015_p3 = scmp.eq.s32.totalorder %s1702_s19, 0  ;;  %s176_s21 = int_to_ptr.vmem [resolvable:$true] %s175_s21 }
   0x4   : > { %p2236_p2 = pnand %p1704_p0, %p157_p1  ;;  %s2158_s23 = scalar_lea.vmem %s176_s21, 9216 }
   0x5   : > { %p2159_p7 = scmp.ne.s32.totalorder %s176_s21, %s2158_s23  ;;  %p2166_p10 = scmp.lt.s32.totalorder %s176_s21, %s176_s21 }
   0x6   : > { %p2011_p4 = pneg %p2236_p2  ;;  %p2167_p11 = scmp.lt.s32.totalorder %s2158_s23, %s2158_s23 }
   0x8   : > { %p2012_p5 = pnand %p2015_p3, %p2011_p4  ;;  %p2168_p12 = por %p2167_p11, %p2166_p10 }
   0xa   : > { %p2149_p6 = pneg %p2012_p5 }
   0xc   : > { %p2161_p8 = pnand %p2159_p7, %p2149_p6 }
   0xe   : > { %p2162_p9 = pneg %p2161_p8 }
  0x10   : > { %p2169_p13 = pnand %p2168_p12, %p2162_p9 }
  0x12   : > { %2172 = shalt.err (!%p2169_p13)
}
  0x13   : > { %s2186_s24 = smov 64   ;;  %s2187_s25 = smov 4  }
  0x14   : > { %2014 = dma.hbm_to_vmem [thread:$0]  (!%p2012_p5), %s2442_s3, 9216, %s176_s21, [#allocation3], %s2186_s24, %s2186_s24, %s2187_s25  }
  0x15   : > { %202 = sbr.rel (%p2236_p2) target bundleno = 1009 (0x3f1), region = 40 }
  0x1a   : > { %2178 = dma.done.wait (%p2015_p3), [#allocation3], 9216  }
  0x1b   : > { %2180 = vsyncadd (%p2015_p3), [#allocation3], 4294958080  ;;  %p230_p0 = scmp.lt.s32.totalorder %s1702_s19, 1  ;;  %s2188_s7 = smov 4   ;;  %v2039_v1 = vld [vmem:[%s2440_s1 + $0x78] sm:$0xff]   ;;  %v2041_v3 = vld [vmem:[%s2440_s1 + $0x70] sm:$0xff]  }
  0x1c   : > { %v2040_v2 = vld [vmem:[%s2440_s1 + $0x38] sm:$0xff]   ;;  %1829 = vmatprep.subr.bf16.mxu0 %v2039_v1  ;;  %v2047_v6 = vld [vmem:[%s2440_s1 + $0xf0] sm:$0xff]   ;;  %v2045_v8 = vld [vmem:[%s2440_s1 + $0x68] sm:$0xff]   ;;  %vm250_vm0 = vcmask 31744   ;;  %vm254_vm1 = vcmask 556032   ;;  %vm264_vm2 = vcmask 1040384  }
  0x1d   : > { %s2449_s19 = smov (!%p230_p0, %s1702_s19), 1  ;;  %v2043_v4 = vld [vmem:[%s2440_s1 + $0xf8] sm:$0xff]   ;;  %1830 = vmatpush3.bf16.msra.mxu0 %v2040_v2  ;;  %v2042_v7 = vld [vmem:[%s2440_s1 + $0x30] sm:$0xff]   ;;  %v2046_v10 = vld [vmem:[%s2440_s1 + $0x28] sm:$0xff]   ;;  %vm265_vm3 = vsmask.f32 256 }
  0x1e   : > { %s1827_s28 = sshll.u32 %s2449_s19, 3  ;;  %v2044_v5 = vld [vmem:[%s2440_s1 + $0xb8] sm:$0xff]   ;;  %1851 = vmatprep.subr.bf16.mxu1 %v2043_v4  ;;  %1831 = vmatprep.subr.bf16.mxu0 %v2041_v3  ;;  %v2048_v9 = vld [vmem:[%s2440_s1 + $0xb0] sm:$0xff]   ;;  %v2051_v11 = vld [vmem:[%s2440_s1 + $0xe8] sm:$0xff]   ;;  %v2189_v41 = vmov 0.0   ;;  %vm367_vm5 = vcmask 1046528  }
  0x1f   : > { %s234_s6 = scalar_lea.vmem %s2439_s0, %s1827_s28  ;;  %1852 = vmatpush3.bf16.msra.mxu1 %v2044_v5  ;;  %v2049_v12 = vld [vmem:[%s2440_s1 + $0x60] sm:$0xff]   ;;  %v2052_v13 = vld [vmem:[%s2440_s1 + $0xa8] sm:$0xff]   ;;  %v2053_v16 = vld [vmem:[%s2440_s1 + $0x58] sm:$0xff]   ;;  %s2190_s28 = smov 120   ;;  %vm347_vm6 = vsmask.f32 7424 }
  0x20   : > { %v2038_v0 = vld [vmem:[%s234_s6] sm:$0xff]   ;;  %1853 = vmatprep.subr.bf16.mxu1 %v2047_v6  ;;  %v2054_v18 = vld [vmem:[%s2440_s1 + $0x18] sm:$0xff]   ;;  %v2057_v19 = vld [vmem:[%s2440_s1 + $0x50] sm:$0xff]   ;;  %s2191_s29 = smov 60   ;;  %s2192_s30 = smov 64   ;;  %vm375_vm7 = vcmask 523264  }
  0x21   : > { %248 = vrot.lane.b32.xlu0 %v2038_v0, %s2188_s7  ;;  %1832 = vmatpush3.bf16.msra.mxu0 %v2042_v7  ;;  %v2055_v14 = vld [vmem:[%s2440_s1 + $0xe0] sm:$0xff]   ;;  %v2058_v20 = vld [vmem:[%s2440_s1 + $0x10] sm:$0xff]   ;;  %v2059_v21 = vld [vmem:[%s2440_s1 + $0xd8] sm:$0xff]   ;;  %s2193_s6 = smov 56   ;;  %s2194_s7 = smov 124   ;;  %vm2195_vm8 = vmmov 0  }
  0x22   : > { %1833 = vmatprep.subr.bf16.mxu0 %v2045_v8  ;;  %v2050_v15 = vld [vmem:[%s2440_s1 + $0x20] sm:$0xff]   ;;  %v2060_v22 = vld [vmem:[%s2440_s1 + $0x98] sm:$0xff]   ;;  %v2061_v23 = vld [vmem:[%s2440_s1 + $0x48] sm:$0xff]   ;;  %s2196_s20 = smov 8   ;;  %vm745_vm9 = vcmask 64512   ;;  %s2197_s21 = smov 112  }
  0x23   : > { %1854 = vmatpush3.bf16.msra.mxu1 %v2048_v9  ;;  %v2056_v17 = vld [vmem:[%s2440_s1 + $0xa0] sm:$0xff]   ;;  %v2062_v24 = vld [vmem:[%s2440_s1 + $0x8] sm:$0xff]   ;;  %v2063_v25 = vld [vmem:[%s2440_s1 + $0xd0] sm:$0xff]   ;;  %vm920_vm10 = vcmask 982016   ;;  %vm927_vm11 = vcmask 916480   ;;  %s1828_s24 = sshll.u32 %s2449_s19, 4 }
  0x24   : > { %1855 = vmatprep.subr.bf16.mxu1 %v2051_v11  ;;  %v2064_v27 = vld [vmem:[%s2440_s1 + $0x90] sm:$0xff]   ;;  %v2065_v30 = vld [vmem:[%s2440_s1 + $0x40] sm:$0xff]   ;;  %v2067_v33 = vld [vmem:[%s2440_s1 + $0xc8] sm:$0xff]   ;;  %s239_s27 = scalar_lea.vmem %s2444_s5, %s1828_s24 }
  0x25   : > { %1834 = vmatpush3.bf16.msra.mxu0 %v2046_v10  ;;  %v2066_v32 = vld [vmem:[%s2440_s1] sm:$0xff]   ;;  %vm2343_vm4 = vmand %vm264_vm2, %vm265_vm3  ;;  %v2068_v35 = vld [vmem:[%s2440_s1 + $0x88] sm:$0xff]  }
  0x26   : > { %1835 = vmatprep.subr.bf16.mxu0 %v2049_v12  ;;  %v2069_v40 = vld [vmem:[%s2440_s1 + $0xc0] sm:$0xff]   ;;  %v2070_v59 = vld [vmem:[%s2440_s1 + $0x118] sm:$0xff]   ;;  %v2072_v62 = vld [vmem:[%s2440_s1 + $0x110] sm:$0xff]  }
  0x27   : > { %1856 = vmatpush3.bf16.msra.mxu1 %v2052_v13  ;;  %v2071_v43 = vld [vmem:[%s2440_s1 + $0x80] sm:$0xff]   ;;  %v2073_v2 = vld [vmem:[%s2440_s1 + $0x108] sm:$0xff]  }
  0x28   : > { %1857 = vmatprep.subr.bf16.mxu1 %v2055_v14  ;;  %v2074_v3 = vld [vmem:[%s2440_s1 + $0x100] sm:$0xff]  }
  0x29   : > { %1836 = vmatpush3.bf16.msra.mxu0 %v2050_v15  ;;  %v1714_v13 = vld [vmem:[%s2441_s2] ss:$0 sm:$0xff] }
  0x2a   : > { %1837 = vmatprep.subr.bf16.mxu0 %v2053_v16 }
  0x2b   : > { %1858 = vmatpush3.bf16.msra.mxu1 %v2056_v17 }
  0x2c   : > { %1859 = vmatprep.subr.bf16.mxu1 %v2059_v21 }
  0x2d   : > { %1838 = vmatpush3.bf16.msra.mxu0 %v2054_v18 }
  0x2e   : > { %1839 = vmatprep.subr.bf16.mxu0 %v2057_v19 }
  0x2f   : > { %1860 = vmatpush3.bf16.msra.mxu1 %v2060_v22 }
  0x30   : > { %1861 = vmatprep.subr.bf16.mxu1 %v2063_v25 }
  0x31   : > { %1840 = vmatpush3.bf16.msra.mxu0 %v2058_v20 }
  0x32   : > { %1841 = vmatprep.subr.bf16.mxu0 %v2061_v23 }
  0x33   : > { %1862 = vmatpush3.bf16.msra.mxu1 %v2064_v27 }
  0x34   : > { %1863 = vmatprep.subr.bf16.mxu1 %v2067_v33  ;;  %v2077_v33 = vld [vmem:[#allocation2 + $0xf8] sm:$0xff]  }
  0x35   : > { %1842 = vmatpush3.bf16.msra.mxu0 %v2062_v24 }
  0x36   : > { %1843 = vmatprep.subr.bf16.mxu0 %v2065_v30 }
  0x37   : > { %1864 = vmatpush3.bf16.msra.mxu1 %v2068_v35  ;;  %v2078_v35 = vld [vmem:[#allocation2 + $0x70] sm:$0xff]  }
  0x38   : > { %1865 = vmatprep.subr.bf16.mxu1 %v2069_v40  ;;  %v2082_v40 = vld [vmem:[#allocation2 + $0x68] sm:$0xff]  }
  0x39   : > { %1844 = vmatpush3.bf16.msra.mxu0 %v2066_v32  ;;  %v2076_v32 = vld [vmem:[#allocation2 + $0x38] sm:$0xff]  }
  0x3a   : > { %1975 = vmatprep.subr.bf16.mxu0 %v2189_v41 }
  0x3b   : > { %1866 = vmatpush3.bf16.msra.mxu1 %v2071_v43  ;;  %v2084_v43 = vld [vmem:[#allocation2 + $0x28] sm:$0xff]  }
  0x93   : > { %v249_v26 = vpop.permute.xlu0 %248 }
  0x94   : > { %v253_v28 = vsel %vm250_vm0, 0, %v249_v26 }
  0x95   : > { %v255_v29 = vsel %vm254_vm1, %v253_v28, 0 }
  0x96   : > { %v256_v31 = vshrl.u32 %v255_v29, 16  ;;  %v259_v37 = vshll.u32 %v255_v29, 16 }
  0x98   : > { %v258_v36 = vrot.slane %v256_v31, 7  ;;  %v2075_v31 = vld [vmem:[#allocation2 + $0x78] sm:$0xff]  }
  0x99   : > { %1878 = vmatprep.subr.bf16.mxu1 %v2075_v31 }
  0x9a   : > { %v261_v38 = vor.u32 %v259_v37, %v258_v36  ;;  %v268_v39 = vsel %vm2343_vm4, %v258_v36, 0  ;;  %v2079_v36 = vld [vmem:[#allocation2 + $0xb8] sm:$0xff]   ;;  %v2081_v37 = vld [vmem:[#allocation2 + $0xf0] sm:$0xff]  }
  0x9b   : > { %v356_v44 = vshll.u32 %v268_v39, 16  ;;  %v369_v45 = vrot.slane %v268_v39, 1  ;;  %v2083_v39 = vld [vmem:[#allocation2 + $0xb0] sm:$0xff]  }
  0x9c   : > { %v267_v42 = vsel %vm2343_vm4, 0, %v261_v38  ;;  %v2080_v38 = vld [vmem:[#allocation2 + $0x30] sm:$0xff]  }
  0x9d   : > { %345 = vrot.lane.b32.xlu0 %v267_v42, %s2190_s28  ;;  %v368_v46 = vrot.slane %v267_v42, 1  ;;  %v351_v47 = vshll.u32 %v267_v42, 16  ;;  %v349_v49 = vshrl.u32 %v267_v42, 16  ;;  %v358_v52 = vrot.slane %v356_v44, 1  ;;  %v2087_v44 = vld [vmem:[#allocation2 + $0xa8] sm:$0xff]  }
  0x9f   : > { %v370_v48 = vsel %vm367_vm5, %v368_v46, %v369_v45  ;;  %v353_v50 = vrot.slane %v351_v47, 1  ;;  %v2086_v45 = vld [vmem:[#allocation2 + $0x60] sm:$0xff]  }
  0xa0   : > { %v2089_v46 = vld [vmem:[#allocation2 + $0xe0] sm:$0xff]  }
  0xa1   : > { %371 = vrot.lane.b32.xlu0 %v370_v48, %s2191_s29  ;;  %v354_v51 = vor.u32 %v353_v50, %v349_v49  ;;  %v2088_v47 = vld [vmem:[#allocation2 + $0x20] sm:$0xff]   ;;  %v2090_v49 = vld [vmem:[#allocation2 + $0x58] sm:$0xff]  }
  0xa2   : > { %v2093_v50 = vld [vmem:[#allocation2 + $0xd8] sm:$0xff]  }
  0xa3   : > { %v359_v53 = vsel %vm347_vm6, %v354_v51, %v358_v52  ;;  %v2092_v51 = vld [vmem:[#allocation2 + $0x18] sm:$0xff]  }
  0xa4   : > { %360 = vrot.lane.b32.xlu1 %v359_v53, %s2192_s30  ;;  %v2095_v52 = vld [vmem:[#allocation2 + $0x98] sm:$0xff]  }
  0xa5   : > { %364 = vrot.lane.b32.xlu0 %v359_v53, %s2193_s6 }
  0xa8   : > { %343 = vrot.lane.b32.xlu1 %v267_v42, %s2191_s29 }
  0xac   : > { %362 = vrot.lane.b32.xlu1 %v359_v53, %s2194_s7  ;;  %v2094_v53 = vld [vmem:[#allocation2 + $0x50] sm:$0xff]  }
  0xb0   : > { %373 = vrot.lane.b32.xlu1 %v370_v48, %s2190_s28 }
 0x10f   : > { %v346_v54 = vpop.permute.xlu0 %345 }
 0x113   : > { %v372_v55 = vpop.permute.xlu0 %371 }
 0x114   : > { %v389_v56 = vsel %vm375_vm7, %v370_v48, %v372_v55  ;;  %v2091_v48 = vld [vmem:[#allocation2 + $0xa0] sm:$0xff]   ;;  %v2096_v55 = vld [vmem:[#allocation2 + $0x10] sm:$0xff]  }
 0x115   : > { %689 = vmatprep.mubr.bf16.mxu1 %v389_v56  ;;  %v2099_v56 = vld [vmem:[#allocation2 + $0x90] sm:$0xff]  }
 0x116   : > { %v361_v57 = vpop.permute.xlu1 %360 }
 0x117   : > { %v381_v58 = vsel %vm375_vm7, %v346_v54, %v361_v57  ;;  %v365_v63 = vpop.permute.xlu0 %364  ;;  %v2097_v54 = vld [vmem:[#allocation2 + $0xd0] sm:$0xff]   ;;  %v2098_v57 = vld [vmem:[#allocation2 + $0x48] sm:$0xff]  }
 0x118   : > { %648 = vmatprep.mubr.bf16.mxu0 %v381_v58  ;;  %v2101_v58 = vld [vmem:[#allocation2 + $0xc8] sm:$0xff]  }
 0x11a   : > { %v344_v60 = vpop.permute.xlu1 %343 }
 0x11b   : > { %v377_v61 = vsel %vm375_vm7, %v267_v42, %v344_v60  ;;  %v2085_v42 = vld [vmem:[#allocation2 + $0xe8] sm:$0xff]  }
 0x11c   : > { %649 = vmatmul.mubr.bf16.vlgmr.msra.gmra.mxu0 %v377_v61  ;;  %v2103_v60 = vld [vmem:[#allocation2 + $0x88] sm:$0xff]   ;;  %v2102_v61 = vld [vmem:[#allocation2 + $0x40] sm:$0xff]  }
 0x11d   : > { %1976 = vmatpush3.bf16.msra.mxu0 %v2070_v59  ;;  %1983 = vmatprep.mubr.msk.bf16.mxu0 %vm2195_vm8, %v2189_v41  ;;  %v2100_v59 = vld [vmem:[#allocation2 + $0x8] sm:$0xff]  }
 0x11e   : > { %v363_v0 = vpop.permute.xlu1 %362  ;;  %1977 = vmatprep.subr.bf16.mxu0 %v2189_v41 }
 0x11f   : > { %v385_v1 = vsel %vm375_vm7, %v363_v0, %v365_v63  ;;  %v2105_v63 = vld [vmem:[#allocation2 + $0xc0] sm:$0xff]  }
 0x120   : > { %690 = vmatmul.mubr.bf16.vlgmr.msra.gmra.mxu1 %v385_v1  ;;  %v2106_v0 = vld [vmem:[#allocation2 + $0x80] sm:$0xff]   ;;  %v2107_v1 = vld [vmem:[#allocation2 + $0x178] sm:$0xff]  }
 0x121   : > { %1978 = vmatpush3.bf16.msra.mxu0 %v2072_v62  ;;  %1879 = vmatpush3.bf16.msra.mxu1 %v2076_v32  ;;  %v2104_v62 = vld [vmem:[#allocation2] sm:$0xff]  }
 0x122   : > { %1979 = vmatprep.subr.bf16.mxu0 %v2189_v41  ;;  %v374_v4 = vpop.permute.xlu1 %373  ;;  %1880 = vmatprep.subr.bf16.mxu1 %v2078_v35 }
 0x125   : > { %1980 = vmatpush3.bf16.msra.mxu0 %v2073_v2  ;;  %1881 = vmatpush3.bf16.msra.mxu1 %v2080_v38  ;;  %v2109_v2 = vld [vmem:[#allocation2 + $0x1f8] sm:$0xff]  }
 0x126   : > { %1981 = vmatprep.subr.bf16.mxu0 %v2189_v41  ;;  %1882 = vmatprep.subr.bf16.mxu1 %v2082_v40  ;;  %v2108_v40 = vld [vmem:[#allocation2 + $0x138] sm:$0xff]  }
 0x129   : > { %1982 = vmatpush3.bf16.msra.mxu0 %v2074_v3  ;;  %1883 = vmatpush3.bf16.msra.mxu1 %v2084_v43  ;;  %v2110_v43 = vld [vmem:[#allocation2 + $0x170] sm:$0xff]  }
 0x12a   : > { %1900 = vmatprep.subr.bf16.mxu0 %v2077_v33  ;;  %1884 = vmatprep.subr.bf16.mxu1 %v2086_v45 }
 0x12c   : > { %1984 = vmatmul.mubr.msk.bf16.vlgmr.msra.gmra.mxu0 %vm375_vm7, %v374_v4 }
 0x12d   : > { %1901 = vmatpush3.bf16.msra.mxu0 %v2079_v36  ;;  %1885 = vmatpush3.bf16.msra.mxu1 %v2088_v47  ;;  %v2112_v47 = vld [vmem:[#allocation2 + $0x130] sm:$0xff]  }
 0x12e   : > { %1902 = vmatprep.subr.bf16.mxu0 %v2081_v37  ;;  %1886 = vmatprep.subr.bf16.mxu1 %v2090_v49 }
 0x131   : > { %1903 = vmatpush3.bf16.msra.mxu0 %v2083_v39  ;;  %1887 = vmatpush3.bf16.msra.mxu1 %v2092_v51  ;;  %v2115_v51 = vld [vmem:[#allocation2 + $0x1b0] sm:$0xff]  }
 0x132   : > { %1904 = vmatprep.subr.bf16.mxu0 %v2085_v42  ;;  %1888 = vmatprep.subr.bf16.mxu1 %v2094_v53 }
 0x135   : > { %1905 = vmatpush3.bf16.msra.mxu0 %v2087_v44  ;;  %1889 = vmatpush3.bf16.msra.mxu1 %v2096_v55  ;;  %v2111_v44 = vld [vmem:[#allocation2 + $0x1b8] sm:$0xff]   ;;  %v2117_v55 = vld [vmem:[#allocation2 + $0x1e8] sm:$0xff]  }
 0x136   : > { %1906 = vmatprep.subr.bf16.mxu0 %v2089_v46  ;;  %1890 = vmatprep.subr.bf16.mxu1 %v2098_v57  ;;  %v2118_v57 = vld [vmem:[#allocation2 + $0x160] sm:$0xff]  }
 0x139   : > { %1907 = vmatpush3.bf16.msra.mxu0 %v2091_v48  ;;  %1891 = vmatpush3.bf16.msra.mxu1 %v2100_v59  ;;  %v2113_v48 = vld [vmem:[#allocation2 + $0x1f0] sm:$0xff]  }
 0x13a   : > { %1908 = vmatprep.subr.bf16.mxu0 %v2093_v50  ;;  %1892 = vmatprep.subr.bf16.mxu1 %v2102_v61  ;;  %v2114_v50 = vld [vmem:[#allocation2 + $0x168] sm:$0xff]   ;;  %v2120_v61 = vld [vmem:[#allocation2 + $0x120] sm:$0xff]  }
 0x13d   : > { %1909 = vmatpush3.bf16.msra.mxu0 %v2095_v52  ;;  %1893 = vmatpush3.bf16.msra.mxu1 %v2104_v62  ;;  %v2121_v62 = vld [vmem:[#allocation2 + $0x1e0] sm:$0xff]  }
 0x13e   : > { %1910 = vmatprep.subr.bf16.mxu0 %v2097_v54  ;;  %1922 = vmatprep.subr.bf16.mxu1 %v2107_v1  ;;  %v2116_v54 = vld [vmem:[#allocation2 + $0x128] sm:$0xff]  }
 0x141   : > { %1911 = vmatpush3.bf16.msra.mxu0 %v2099_v56 }
 0x142   : > { %1912 = vmatprep.subr.bf16.mxu0 %v2101_v58  ;;  %v2119_v58 = vld [vmem:[#allocation2 + $0x1a8] sm:$0xff]  }
 0x145   : > { %1913 = vmatpush3.bf16.msra.mxu0 %v2103_v60 }
 0x146   : > { %1914 = vmatprep.subr.bf16.mxu0 %v2105_v63  ;;  %v2122_v63 = vld [vmem:[#allocation2 + $0x158] sm:$0xff]  }
 0x149   : > { %1915 = vmatpush3.bf16.msra.mxu0 %v2106_v0  ;;  %v2123_v0 = vld [vmem:[#allocation2 + $0x1a0] sm:$0xff]  }
 0x14a   : > { %1944 = vmatprep.subr.bf16.mxu0 %v2109_v2 }
 0x1dc   : > { %v1845_v5 = vpop.f32.mrf.mxu0 }
 0x1de   : > { %v1846_v6 = vpop.f32.mrf.mxu0 }
 0x1df   : > { %v1847_v12 = vadd.f32 %v1846_v6, %v1845_v5 }
 0x1e0   : > { %v1867_v7 = vpop.f32.mrf.mxu1  ;;  %v1848_v8 = vpop.f32.mrf.mxu0 }
 0x1e1   : > { %v651_v17 = vadd.f32 %v1847_v12, %v1714_v13 }
 0x1e2   : > { %v1868_v9 = vpop.f32.mrf.mxu1  ;;  %v1849_v11 = vpop.f32.mrf.mxu0 }
 0x1e3   : > { %v1850_v15 = vadd.f32 %v1849_v11, %v1848_v8  ;;  %v1869_v16 = vadd.f32 %v1868_v9, %v1867_v7 }
 0x1e4   : > { %v1870_v10 = vpop.f32.mrf.mxu1 }
 0x1e5   : > { %v654_v20 = vadd.f32 %v1850_v15, %v1714_v13  ;;  %v692_v21 = vadd.f32 %v1869_v16, %v651_v17 }
 0x1e6   : > { %v1871_v14 = vpop.f32.mrf.mxu1 }
 0x1e7   : > { %v1872_v18 = vadd.f32 %v1871_v14, %v1870_v10 }
 0x1e9   : > { %v695_v24 = vadd.f32 %v1872_v18, %v654_v20 }
 0x1ec   : > { %v732_v19 = vpop.f32.mrf.mxu0 }
 0x1ed   : > { %v733_v23 = vadd.f32 %v732_v19, %v692_v21 }
 0x1ee   : > { %v1985_v22 = vpop.f32.mrf.mxu0 }
 0x1ef   : > { %v739_v28 = vmax.f32 %v733_v23, 0.0 }
 0x1f0   : > { %v735_v25 = vpop.f32.mrf.mxu0 }
 0x1f1   : > { %v736_v26 = vadd.f32 %v735_v25, %v695_v24 }
 0x1f2   : > { %v1986_v27 = vpop.f32.mrf.mxu0 }
 0x1f3   : > { %v740_v29 = vmax.f32 %v736_v26, 0.0 }
 0x1f5   : > { %v741_v30 = vpack.c.bf16 %v740_v29, %v739_v28 }
 0x1f7   : > { %743 = vrot.lane.b32.xlu0 %v741_v30, %s2196_s20 }
 0x269   : > { %v744_v3 = vpop.permute.xlu0 %743 }
 0x26a   : > { %v747_v4 = vsel %vm745_vm9, 0, %v744_v3  ;;  %v748_v5 = vsel %vm745_vm9, %v744_v3, 0  ;;  %v2124_v3 = vld [vmem:[#allocation2 + $0x118] sm:$0xff]  }
 0x26b   : > { %v749_v6 = vshrl.u32 %v747_v4, 16  ;;  %v755_v7 = vshrl.u32 %v748_v5, 16  ;;  %v752_v9 = vshll.u32 %v747_v4, 16  ;;  %v758_v11 = vshll.u32 %v748_v5, 16  ;;  %v2125_v4 = vld [vmem:[#allocation2 + $0x1d8] sm:$0xff]  }
 0x26d   : > { %v751_v8 = vrot.slane %v749_v6, 7  ;;  %v757_v10 = vrot.slane %v755_v7, 7  ;;  %v2126_v6 = vld [vmem:[#allocation2 + $0x150] sm:$0xff]   ;;  %v2127_v7 = vld [vmem:[#allocation2 + $0x198] sm:$0xff]  }
 0x26f   : > { %v754_v12 = vor.u32 %v752_v9, %v751_v8  ;;  %v760_v13 = vor.u32 %v758_v11, %v757_v10  ;;  %v767_v14 = vsel %vm2343_vm4, %v751_v8, 0  ;;  %v768_v15 = vsel %vm2343_vm4, %v757_v10, 0  ;;  %v2128_v8 = vld [vmem:[#allocation2 + $0x110] sm:$0xff]   ;;  %v2130_v10 = vld [vmem:[#allocation2 + $0x148] sm:$0xff]  }
 0x270   : > { %v938_v18 = vshll.u32 %v767_v14, 16  ;;  %v951_v20 = vshll.u32 %v768_v15, 16  ;;  %v974_v33 = vrot.slane %v768_v15, 1  ;;  %v969_v35 = vrot.slane %v767_v14, 1  ;;  %v2129_v9 = vld [vmem:[#allocation2 + $0x1d0] sm:$0xff]   ;;  %v2134_v14 = vld [vmem:[#allocation2 + $0x140] sm:$0xff]  }
 0x271   : > { %v765_v16 = vsel %vm2343_vm4, 0, %v754_v12  ;;  %v766_v17 = vsel %vm2343_vm4, 0, %v760_v13  ;;  %v2131_v11 = vld [vmem:[#allocation2 + $0x190] sm:$0xff]   ;;  %v2132_v12 = vld [vmem:[#allocation2 + $0x108] sm:$0xff]  }
 0x272   : > { %918 = vrot.lane.b32.xlu0 %v766_v17, %s2190_s28  ;;  %916 = vrot.lane.b32.xlu1 %v765_v16, %s2190_s28  ;;  %v933_v19 = vshll.u32 %v765_v16, 16  ;;  %v946_v21 = vshll.u32 %v766_v17, 16  ;;  %v931_v22 = vshrl.u32 %v765_v16, 16  ;;  %v944_v24 = vshrl.u32 %v766_v17, 16  ;;  %v2133_v13 = vld [vmem:[#allocation2 + $0x1c8] sm:$0xff]  }
 0x273   : > { %v940_v27 = vrot.slane %v938_v18, 1  ;;  %v953_v34 = vrot.slane %v951_v20, 1  ;;  %v973_v31 = vrot.slane %v766_v17, 1  ;;  %v968_v32 = vrot.slane %v765_v16, 1  ;;  %v2135_v15 = vld [vmem:[#allocation2 + $0x188] sm:$0xff]   ;;  %v2138_v18 = vld [vmem:[#allocation2 + $0x180] sm:$0xff]  }
 0x274   : > { %v935_v23 = vrot.slane %v933_v19, 1  ;;  %v948_v25 = vrot.slane %v946_v21, 1  ;;  %v2139_v19 = vld [vmem:[#allocation2 + $0x238] sm:$0xff]   ;;  %v2140_v21 = vld [vmem:[#allocation2 + $0x230] sm:$0xff]  }
 0x275   : > { %v975_v36 = vsel %vm367_vm5, %v973_v31, %v974_v33  ;;  %v2406_v37 = vsel %vm367_vm5, %v968_v32, %v969_v35 }
 0x276   : > { %925 = vrot.lane.b32.xlu0 %v766_v17, %s2197_s21  ;;  %923 = vrot.lane.b32.xlu1 %v765_v16, %s2197_s21  ;;  %v936_v26 = vor.u32 %v935_v23, %v931_v22  ;;  %v949_v28 = vor.u32 %v948_v25, %v944_v24  ;;  %v2137_v17 = vld [vmem:[#allocation2 + $0x1c0] sm:$0xff]   ;;  %v2141_v22 = vld [vmem:[#allocation2 + $0x228] sm:$0xff]   ;;  %v2143_v24 = vld [vmem:[#allocation2 + $0x218] sm:$0xff]  }
 0x277   : > { %v2142_v23 = vld [vmem:[#allocation2 + $0x220] sm:$0xff]   ;;  %v2144_v25 = vld [vmem:[#allocation2 + $0x210] sm:$0xff]  }
 0x278   : > { %v941_v29 = vsel %vm347_vm6, %v936_v26, %v940_v27  ;;  %v954_v30 = vsel %vm347_vm6, %v949_v28, %v953_v34  ;;  %v2145_v26 = vld [vmem:[#allocation2 + $0x208] sm:$0xff]   ;;  %v2146_v27 = vld [vmem:[#allocation2 + $0x200] sm:$0xff]  }
 0x279   : > { %1499 = vmatprep.mubr.bf16.mxu0 %v941_v29 }
 0x27a   : > { %963 = vrot.lane.b32.xlu0 %v954_v30, %s2197_s21  ;;  %961 = vrot.lane.b32.xlu1 %v941_v29, %s2197_s21 }
 0x27e   : > { %957 = vrot.lane.b32.xlu0 %v954_v30, %s2190_s28  ;;  %955 = vrot.lane.b32.xlu1 %v941_v29, %s2190_s28 }
 0x282   : > { %978 = vrot.lane.b32.xlu0 %v975_v36, %s2190_s28  ;;  %976 = vrot.lane.b32.xlu1 %v2406_v37, %s2190_s28 }
 0x286   : > { %984 = vrot.lane.b32.xlu0 %v975_v36, %s2197_s21  ;;  %982 = vrot.lane.b32.xlu1 %v2406_v37, %s2197_s21 }
 0x2e4   : > { %v919_v38 = vpop.permute.xlu0 %918  ;;  %v917_v39 = vpop.permute.xlu1 %916 }
 0x2e5   : > { %v921_v42 = vsel %vm920_vm10, %v917_v39, %v919_v38 }
 0x2e6   : > { %1458 = vmatprep.mubr.bf16.mxu1 %v921_v42 }
 0x2e7   : > { %1459 = vmatmul.mubr.bf16.vlgmr.msra.gmra.mxu1 %v765_v16  ;;  %v2136_v16 = vld [vmem:[#allocation2 + $0x100] sm:$0xff]  }
 0x2e8   : > { %1923 = vmatpush3.bf16.msra.mxu1 %v2108_v40  ;;  %v926_v45 = vpop.permute.xlu0 %925  ;;  %v924_v46 = vpop.permute.xlu1 %923 }
 0x2e9   : > { %v928_v49 = vsel %vm927_vm11, %v924_v46, %v926_v45  ;;  %1924 = vmatprep.subr.bf16.mxu1 %v2110_v43 }
 0x2ea   : > { %1500 = vmatmul.mubr.bf16.vlgmr.msra.gmra.mxu0 %v928_v49 }
 0x2eb   : > { %1945 = vmatpush3.bf16.msra.mxu0 %v2111_v44 }
 0x2ec   : > { %1925 = vmatpush3.bf16.msra.mxu1 %v2112_v47  ;;  %v964_v52 = vpop.permute.xlu0 %963  ;;  %v962_v53 = vpop.permute.xlu1 %961  ;;  %1946 = vmatprep.subr.bf16.mxu0 %v2113_v48 }
 0x2ed   : > { %1926 = vmatprep.subr.bf16.mxu1 %v2114_v50  ;;  %v965_v56 = vsel %vm927_vm11, %v962_v53, %v964_v52 }
 0x2ee   : > { %1540 = vmatprep.mubr.bf16.mxu1 %v965_v56 }
 0x2ef   : > { %1947 = vmatpush3.bf16.msra.mxu0 %v2115_v51 }
 0x2f0   : > { %1927 = vmatpush3.bf16.msra.mxu1 %v2116_v54  ;;  %v958_v59 = vpop.permute.xlu0 %957  ;;  %v956_v60 = vpop.permute.xlu1 %955  ;;  %1948 = vmatprep.subr.bf16.mxu0 %v2117_v55 }
 0x2f1   : > { %1928 = vmatprep.subr.bf16.mxu1 %v2118_v57  ;;  %v959_v20 = vsel %vm920_vm10, %v956_v60, %v958_v59 }
 0x2f3   : > { %1949 = vmatpush3.bf16.msra.mxu0 %v2119_v58 }
 0x2f4   : > { %1929 = vmatpush3.bf16.msra.mxu1 %v2120_v61  ;;  %v979_v1 = vpop.permute.xlu0 %978  ;;  %v977_v2 = vpop.permute.xlu1 %976  ;;  %1950 = vmatprep.subr.bf16.mxu0 %v2121_v62 }
 0x2f5   : > { %1930 = vmatprep.subr.bf16.mxu1 %v2122_v63  ;;  %v980_v5 = vsel %vm920_vm10, %v977_v2, %v979_v1 }
 0x2f6   : > { %1581 = vmatprep.mubr.bf16.mxu0 %v980_v5 }
 0x2f7   : > { %1951 = vmatpush3.bf16.msra.mxu0 %v2123_v0 }
 0x2f8   : > { %1931 = vmatpush3.bf16.msra.mxu1 %v2124_v3  ;;  %1952 = vmatprep.subr.bf16.mxu0 %v2125_v4  ;;  %v985_v28 = vpop.permute.xlu0 %984  ;;  %v983_v34 = vpop.permute.xlu1 %982 }
 0x2f9   : > { %1932 = vmatprep.subr.bf16.mxu1 %v2126_v6  ;;  %v986_v29 = vsel %vm927_vm11, %v983_v34, %v985_v28 }
 0x2fb   : > { %1953 = vmatpush3.bf16.msra.mxu0 %v2127_v7 }
 0x2fc   : > { %1933 = vmatpush3.bf16.msra.mxu1 %v2128_v8  ;;  %1954 = vmatprep.subr.bf16.mxu0 %v2129_v9 }
 0x2fd   : > { %1934 = vmatprep.subr.bf16.mxu1 %v2130_v10 }
 0x2ff   : > { %1955 = vmatpush3.bf16.msra.mxu0 %v2131_v11 }
 0x300   : > { %1935 = vmatpush3.bf16.msra.mxu1 %v2132_v12  ;;  %1956 = vmatprep.subr.bf16.mxu0 %v2133_v13 }
 0x301   : > { %1936 = vmatprep.subr.bf16.mxu1 %v2134_v14 }
 0x303   : > { %1957 = vmatpush3.bf16.msra.mxu0 %v2135_v15 }
 0x304   : > { %1937 = vmatpush3.bf16.msra.mxu1 %v2136_v16  ;;  %1958 = vmatprep.subr.bf16.mxu0 %v2137_v17 }
 0x305   : > { %1987 = vmatprep.subr.bf16.mxu1 %v2189_v41 }
 0x307   : > { %1541 = vmatmul.mubr.bf16.vlgmr.msra.gmra.mxu1 %v959_v20  ;;  %1959 = vmatpush3.bf16.msra.mxu0 %v2138_v18 }
 0x308   : > { %1988 = vmatpush3.bf16.msra.mxu1 %v2139_v19  ;;  %2003 = vmatprep.mubr.msk.bf16.mxu1 %vm2195_vm8, %v2189_v41 }
 0x309   : > { %1989 = vmatprep.subr.bf16.mxu1 %v2189_v41 }
 0x30a   : > { %1582 = vmatmul.mubr.bf16.vlgmr.msra.gmra.mxu0 %v2406_v37 }
 0x30c   : > { %1990 = vmatpush3.bf16.msra.mxu1 %v2140_v21 }
 0x30d   : > { %1991 = vmatprep.subr.bf16.mxu1 %v2189_v41 }
 0x310   : > { %1992 = vmatpush3.bf16.msra.mxu1 %v2141_v22 }
 0x311   : > { %1993 = vmatprep.subr.bf16.mxu1 %v2189_v41 }
 0x314   : > { %1994 = vmatpush3.bf16.msra.mxu1 %v2142_v23 }
 0x315   : > { %1995 = vmatprep.subr.bf16.mxu1 %v2189_v41 }
 0x318   : > { %1996 = vmatpush3.bf16.msra.mxu1 %v2143_v24 }
 0x319   : > { %1997 = vmatprep.subr.bf16.mxu1 %v2189_v41 }
 0x31c   : > { %1998 = vmatpush3.bf16.msra.mxu1 %v2144_v25 }
 0x31d   : > { %1999 = vmatprep.subr.bf16.mxu1 %v2189_v41 }
 0x320   : > { %2000 = vmatpush3.bf16.msra.mxu1 %v2145_v26 }
 0x321   : > { %2001 = vmatprep.subr.bf16.mxu1 %v2189_v41  ;;  %v1752_v41 = vld [vmem:[%s2443_s4] ss:$0 sm:$0xff] }
 0x324   : > { %2002 = vmatpush3.bf16.msra.mxu1 %v2146_v27 }
 0x327   : > { %2004 = vmatmul.mubr.bf16.vlgmr.msra.gmra.mxu1 %v986_v29 }
 0x3a7   : > { %v1894_v30 = vpop.f32.mrf.mxu1 }
 0x3a9   : > { %v1895_v31 = vpop.f32.mrf.mxu1 }
 0x3aa   : > { %v1916_v32 = vpop.f32.mrf.mxu0  ;;  %v1896_v43 = vadd.f32 %v1895_v31, %v1894_v30 }
 0x3ab   : > { %v1897_v33 = vpop.f32.mrf.mxu1 }
 0x3ac   : > { %v1917_v35 = vpop.f32.mrf.mxu0  ;;  %v1461_v46 = vadd.f32 %v1896_v43, %v1752_v41 }
 0x3ad   : > { %v1898_v36 = vpop.f32.mrf.mxu1  ;;  %v1918_v47 = vadd.f32 %v1917_v35, %v1916_v32 }
 0x3ae   : > { %v1919_v37 = vpop.f32.mrf.mxu0  ;;  %v1899_v48 = vadd.f32 %v1898_v36, %v1897_v33 }
 0x3af   : > { %v1502_v52 = vadd.f32 %v1918_v47, %v1461_v46 }
 0x3b0   : > { %v1920_v39 = vpop.f32.mrf.mxu0  ;;  %v1464_v53 = vadd.f32 %v1899_v48, %v1752_v41 }
 0x3b1   : > { %v1921_v54 = vadd.f32 %v1920_v39, %v1919_v37 }
 0x3b3   : > { %v1505_v59 = vadd.f32 %v1921_v54, %v1464_v53 }
 0x3c7   : > { %v1938_v38 = vpop.f32.mrf.mxu1 }
 0x3c9   : > { %v1939_v40 = vpop.f32.mrf.mxu1 }
 0x3ca   : > { %v1960_v42 = vpop.f32.mrf.mxu0  ;;  %v1940_v49 = vadd.f32 %v1939_v40, %v1938_v38 }
 0x3cb   : > { %v1941_v44 = vpop.f32.mrf.mxu1 }
 0x3cc   : > { %v1961_v45 = vpop.f32.mrf.mxu0  ;;  %v1543_v55 = vadd.f32 %v1940_v49, %v1502_v52 }
 0x3cd   : > { %v1942_v50 = vpop.f32.mrf.mxu1  ;;  %v1962_v56 = vadd.f32 %v1961_v45, %v1960_v42 }
 0x3ce   : > { %v1963_v51 = vpop.f32.mrf.mxu0  ;;  %v1943_v57 = vadd.f32 %v1942_v50, %v1941_v44 }
 0x3cf   : > { %v1584_v62 = vadd.f32 %v1962_v56, %v1543_v55 }
 0x3d0   : > { %v1964_v58 = vpop.f32.mrf.mxu0  ;;  %v1546_v60 = vadd.f32 %v1943_v57, %v1505_v59 }
 0x3d1   : > { %v1965_v61 = vadd.f32 %v1964_v58, %v1963_v51 }
 0x3d3   : > { %v1587_v3 = vadd.f32 %v1965_v61, %v1546_v60 }
 0x3e7   : > { %v1624_v63 = vpop.f32.mrf.mxu1 }
 0x3e8   : > { %v1625_v0 = vadd.f32 %v1624_v63, %v1584_v62 }
 0x3e9   : > { %v2005_v1 = vpop.f32.mrf.mxu1 }
 0x3ea   : > { %v1631_v2 = vmax.f32 %v1625_v0, 0.0 }
 0x3eb   : > { %v1627_v4 = vpop.f32.mrf.mxu1 }
 0x3ec   : > { %1633 = vst [vmem:[%s239_s27] sm:$0xff] %v1631_v2  ;;  %v1628_v5 = vadd.f32 %v1627_v4, %v1587_v3 }
 0x3ed   : > { %v2006_v6 = vpop.f32.mrf.mxu1 }
 0x3ee   : > { %v1632_v7 = vmax.f32 %v1628_v5, 0.0 }
 0x3f0   : > { %1634 = vst [vmem:[%s239_s27 + $0x8] sm:$0xff] %v1632_v7 }
 0x3f1 PF: > { %s16_s18 = sadd.s32 1, %s2183_s18  }
 0x3f2   : > { %p13_p1 = scmp.ge.s32.totalorder %s16_s18, 4  }
 0x3f4   :  { %15 = sbr.rel (!%p13_p1) target bundleno = 1 (0x1), region = 75 }
 0x3f9   :  { %1656 = vsyncpa [#allocation3], 1 }
 0x3fa   :  { %1658 = vsyncpa [#allocation3 + $0x1], 1 }

</bundles_post_ra>
